<compile_context>
chip_gen: v6e
topology: v6e:2x2x1
jax: 0.10.0
libtpu: 0.0.40
codegen_flags: <defaults>
</compile_context>

<pallas_src>
import jax
import jax.numpy as jnp
from jax import lax
from jax.experimental import pallas as pl
from jax.experimental.pallas import tpu as pltpu  # noqa: F401  (kept for TPU-specific tuning hooks)


def fused_dense_kernel(x_ref, w_ref, bn_ref, o_ref):
    # x_ref:  (R, in_c)     -- user rows followed by item rows (no padding)
    # w_ref:  (in_c, out_c) -- shared Linear weight, pre-transposed
    # bn_ref: (R, 2)        -- per-row eval-mode BN affine: [:, 0] = scale, [:, 1] = shift
    # o_ref:  (R, out_c)
    y = jnp.dot(x_ref[...], w_ref[...], preferred_element_type=jnp.float32)  # (R, out_c)
    y = y * bn_ref[:, 0:1] + bn_ref[:, 1:2]          # per-row BatchNorm1d (eval mode)
    o_ref[...] = jnp.maximum(y, 0.0).astype(o_ref.dtype)  # ReLU (always applied)


def dense_layer_forward(u_features, i_features, params, *, bn=True, eps=1e-5):
    """Pallas implementation of DenseLayer.forward (inference semantics)."""
    # TODO(synk): training-mode dropout / batch-statistics BN not implemented (eval semantics).
    n_u, in_c = u_features.shape
    n_i = i_features.shape[0]
    R = n_u + n_i
    dtype = u_features.dtype

    # One-time transpose to (in_c, out_c); in real use do this at parameter-load time.
    w_t = params["fc_weight"].T.astype(dtype)
    out_c = w_t.shape[1]

    # Both branches concatenated along rows: users first, items second.
    x = jnp.concatenate([u_features, i_features], axis=0)            # (R, in_c)

    if bn:
        gamma = jnp.concatenate([params["bn_u_gamma"], params["bn_i_gamma"]])
        beta = jnp.concatenate([params["bn_u_beta"], params["bn_i_beta"]])
        mean = jnp.concatenate([params["bn_u_mean"], params["bn_i_mean"]])
        var = jnp.concatenate([params["bn_u_var"], params["bn_i_var"]])
        scale = gamma.astype(jnp.float32) * lax.rsqrt(var.astype(jnp.float32) + eps)
        shift = beta.astype(jnp.float32) - mean.astype(jnp.float32) * scale
    else:
        scale = jnp.ones((R,), jnp.float32)
        shift = jnp.zeros((R,), jnp.float32)
    bn_packed = jnp.stack([scale, shift], axis=-1)                   # (R, 2)

    # Single invocation, no grid: every operand is a full-array VMEM block.
    out = pl.pallas_call(
        fused_dense_kernel,
        out_shape=jax.ShapeDtypeStruct((R, out_c), dtype),
    )(x, w_t, bn_packed)

    return out[:n_u], out[n_u:]


def _reference(u, i, params, *, bn=True, eps=1e-5):
    w_t = params["fc_weight"].T

    def branch(x, gamma, beta, rmean, rvar):
        y = x @ w_t
        if bn:
            scale = gamma / jnp.sqrt(rvar + eps)
            shift = beta - rmean * scale
            y = y * scale[:, None] + shift[:, None]
        return jnp.maximum(y, 0.0)

    return (branch(u, params["bn_u_gamma"], params["bn_u_beta"],
                   params["bn_u_mean"], params["bn_u_var"]),
            branch(i, params["bn_i_gamma"], params["bn_i_beta"],
                   params["bn_i_mean"], params["bn_i_var"]))


if __name__ == "__main__":
    # config: hidden_size = [32, 32], num_users = 16, num_nodes = 40 -> num_items = 24
    in_c, out_c = 32, 32
    num_users, num_items = 16, 24

    key = jax.random.PRNGKey(0)
    (k_u, k_i, k_w, k_gu, k_bu, k_mu, k_vu,
     k_gi, k_bi, k_mi, k_vi) = jax.random.split(key, 11)

    u_features = jax.random.normal(k_u, (num_users, in_c), jnp.float32)
    i_features = jax.random.normal(k_i, (num_items, in_c), jnp.float32)

    params = {
        "fc_weight": jax.random.normal(k_w, (out_c, in_c), jnp.float32) * 0.1,
        "bn_u_gamma": 1.0 + 0.1 * jax.random.normal(k_gu, (num_users,), jnp.float32),
        "bn_u_beta": 0.1 * jax.random.normal(k_bu, (num_users,), jnp.float32),
        "bn_u_mean": 0.1 * jax.random.normal(k_mu, (num_users,), jnp.float32),
        "bn_u_var": jnp.abs(1.0 + 0.1 * jax.random.normal(k_vu, (num_users,), jnp.float32)),
        "bn_i_gamma": 1.0 + 0.1 * jax.random.normal(k_gi, (num_items,), jnp.float32),
        "bn_i_beta": 0.1 * jax.random.normal(k_bi, (num_items,), jnp.float32),
        "bn_i_mean": 0.1 * jax.random.normal(k_mi, (num_items,), jnp.float32),
        "bn_i_var": jnp.abs(1.0 + 0.1 * jax.random.normal(k_vi, (num_items,), jnp.float32)),
    }

    # jit the wrapper so the concat / transpose / BN-fold HLOs fuse around the kernel.
    fwd = jax.jit(lambda u, i, p: dense_layer_forward(u, i, p, bn=True))

    u_out, i_out = fwd(u_features, i_features, params)
    jax.block_until_ready((u_out, i_out))

    u_ref, i_ref = _reference(u_features, i_features, params, bn=True)
    assert u_out.shape == (num_users, out_c) and i_out.shape == (num_items, out_c)
    assert jnp.allclose(u_out, u_ref, atol=1e-5, rtol=1e-5)
    assert jnp.allclose(i_out, i_ref, atol=1e-5, rtol=1e-5)

    print("KERNEL_OK")
</pallas_src>

<mosaic_0001>
module attributes {stable_mosaic.version = 11 : i64} {
  func.func @fused_dense_kernel(%arg0: memref<40x32xf32, #tpu.memory_space<vmem>>, %arg1: memref<32x32xf32, #tpu.memory_space<vmem>>, %arg2: memref<40x2xf32, #tpu.memory_space<vmem>>, %arg3: memref<40x32xf32, #tpu.memory_space<vmem>>) attributes {dimension_semantics = [], scalar_prefetch = 0 : i64, scratch_operands = 0 : i64, tpu.core_type = #tpu.core_type<tc>} {
    %c0 = arith.constant 0 : index
    %c0_0 = arith.constant 0 : index
    %0 = vector.load %arg0[%c0, %c0_0] : memref<40x32xf32, #tpu.memory_space<vmem>>, vector<40x32xf32>
    %c0_1 = arith.constant 0 : index
    %c0_2 = arith.constant 0 : index
    %1 = vector.load %arg1[%c0_1, %c0_2] : memref<32x32xf32, #tpu.memory_space<vmem>>, vector<32x32xf32>
    %cst = arith.constant dense<0.000000e+00> : vector<40x32xf32>
    %2 = tpu.matmul %0, %1, %cst {dimension_numbers = #tpu.dot_dimension_numbers<[1], [0], [0], [1], [0, 0, 1, 1], [], []>} : vector<40x32xf32>, vector<32x32xf32>, vector<40x32xf32> -> vector<40x32xf32>
    %c0_3 = arith.constant 0 : index
    %c0_4 = arith.constant 0 : index
    %3 = vector.load %arg2[%c0_3, %c0_4] : memref<40x2xf32, #tpu.memory_space<vmem>>, vector<40x1xf32>
    %4 = vector.broadcast %3 : vector<40x1xf32> to vector<40x32xf32>
    %5 = arith.mulf %2, %4 : vector<40x32xf32>
    %c0_5 = arith.constant 0 : index
    %c1 = arith.constant 1 : index
    %6 = vector.load %arg2[%c0_5, %c1] : memref<40x2xf32, #tpu.memory_space<vmem>>, vector<40x1xf32>
    %7 = vector.broadcast %6 : vector<40x1xf32> to vector<40x32xf32>
    %8 = arith.addf %5, %7 : vector<40x32xf32>
    %cst_6 = arith.constant 0.000000e+00 : f32
    %9 = vector.broadcast %cst_6 : f32 to vector<40x32xf32>
    %10 = arith.maximumf %8, %9 : vector<40x32xf32>
    %c0_7 = arith.constant 0 : index
    %c0_8 = arith.constant 0 : index
    %11 = vector.load %arg3[%c0_7, %c0_8] : memref<40x32xf32, #tpu.memory_space<vmem>>, vector<40x32xf32>
    tpu.vector_store %arg3[%c0_7, %c0_8], %10 {strides = array<i32>} : memref<40x32xf32, #tpu.memory_space<vmem>>, vector<40x32xf32>,
    return
  }
}

</mosaic_0001>

<bundles_post_ra>
// kernel: _lambda_.1
= control target key start
LH: loop header
LB: loop body
LE: loop exit
PB: predicated region body
PF: predicated region fallthrough
CT: control target
= control target key end

     0   :  { %v256_v0 = vmov 0.0   ;;  %vm23_vm0 = vcmask 261120   ;;  %vm257_vm1 = vmmov 0   ;;  %v258_v11 = vmov 0   ;;  %s352_s1 = inlined_call_operand.vmem [shape: f32[32,32], index: 1, kind: input, shape index: {}]   ;;  %s353_s0 = inlined_call_operand.vmem [shape: f32[40,32], index: 0, kind: input, shape index: {}]   ;;  %s354_s2 = inlined_call_operand.vmem [shape: f32[40,2], index: 2, kind: input, shape index: {}]   ;;  %s355_s3 = inlined_call_operand.vmem [shape: f32[40,32], index: 3, kind: output, shape index: {}]  }
   0x1   :  { %217 = vmatprep.subr.mxu0 %v256_v0  ;;  %240 = vmatprep.subr.mxu1 %v256_v0  ;;  %v22_v1 = vld [vmem:[%s352_s1 + $0x18] sm:$0xff]  ;;  %v21_v2 = vld [vmem:[%s352_s1 + $0x10] sm:$0xff]  ;;  %v20_v3 = vld [vmem:[%s352_s1 + $0x8] sm:$0xff]  ;;  %v259_v16 = vmov 1  }
   0x2   :  { %218 = vmatpush3.msra.mxu0 %v22_v1  ;;  %244 = vmatpush3.msra.mxu1 %v22_v1  ;;  %v19_v4 = vld [vmem:[%s352_s1] sm:$0xff]  ;;  %v17_v6 = vld [vmem:[%s353_s0 + $0x18] sm:$0xff]  ;;  %v131_v7 = vld [vmem:[%s354_s2 + $0x10] sm:$0xff] }
   0x3   :  { %219 = vmatprep.subr.mxu0 %v256_v0  ;;  %241 = vmatprep.subr.mxu1 %v256_v0  ;;  %v14_v5 = vld [vmem:[%s353_s0] sm:$0xff]  ;;  %v15_v9 = vld [vmem:[%s353_s0 + $0x8] sm:$0xff]  ;;  %v132_v12 = vld [vmem:[%s354_s2 + $0x18] sm:$0xff] }
   0x4   :  { %220 = vmatpush3.msra.mxu0 %v21_v2  ;;  %245 = vmatpush3.msra.mxu1 %v21_v2  ;;  %v129_v8 = vld [vmem:[%s354_s2] sm:$0xff]  ;;  %v130_v13 = vld [vmem:[%s354_s2 + $0x8] sm:$0xff]  ;;  %v16_v14 = vld [vmem:[%s353_s0 + $0x10] sm:$0xff] }
   0x5   :  { %221 = vmatprep.subr.mxu0 %v256_v0  ;;  %242 = vmatprep.subr.mxu1 %v256_v0  ;;  %v18_v10 = vld [vmem:[%s353_s0 + $0x20] sm:$0xff] }
   0x6   :  { %222 = vmatpush3.msra.mxu0 %v20_v3  ;;  %246 = vmatpush3.msra.mxu1 %v20_v3  ;;  %v133_v15 = vld [vmem:[%s354_s2 + $0x20] sm:$0xff] }
   0x7   :  { %223 = vmatprep.subr.mxu0 %v256_v0  ;;  %243 = vmatprep.subr.mxu1 %v256_v0 }
   0x8   :  { %224 = vmatpush3.msra.mxu0 %v19_v4  ;;  %247 = vmatpush3.msra.mxu1 %v19_v4 }
   0x9   :  { %225 = vmatprep.mubr.msk.f32.mxu0 %vm257_vm1, %v256_v0  ;;  %234 = vmatprep.mubr.msk.f32.mxu1 %vm257_vm1, %v256_v0 }
   0xa   :  { %226 = vmatmul.mubr.msk.f32.vlgmr.msra.gmra.mxu0 %vm23_vm0, %v14_v5  ;;  %235 = vmatmul.mubr.msk.f32.vlgmr.msra.gmra.mxu1 %vm23_vm0, %v17_v6 }
   0xb   :  { %228 = vmatprep.mubr.msk.f32.mxu0 %vm257_vm1, %v256_v0  ;;  %237 = vmatprep.mubr.msk.f32.mxu1 %vm257_vm1, %v256_v0 }
   0xc   :  { %253 = vset.pattern.permute.xlu1 %v258_v11  ;;  %252 = vset.pattern.permute.xlu0 %v258_v11 }
   0xd   :  { %146 = vperm.xlu1 %253, %v131_v7   ;;  %136 = vperm.xlu0 %252, %v129_v8  }
   0xe   :  { %229 = vmatmul.mubr.msk.f32.gmra.mxu0 %vm23_vm0, %v15_v9  ;;  %238 = vmatmul.mubr.msk.f32.gmra.mxu1 %vm23_vm0, %v18_v10 }
   0xf   :  { %231 = vmatprep.mubr.msk.f32.mxu0 %vm257_vm1, %v256_v0 }
  0x11   :  { %151 = vperm.xlu1 %253, %v132_v12   ;;  %141 = vperm.xlu0 %252, %v130_v13  }
  0x12   :  { %232 = vmatmul.mubr.msk.f32.gmra.mxu0 %vm23_vm0, %v16_v14 }
  0x15   :  { %254 = vset.pattern.permute.xlu1 %v259_v16  ;;  %156 = vperm.xlu0 %252, %v133_v15  }
  0x16   :  { %165 = vperm.xlu1 %254, %v129_v8  }
  0x19   :  { %255 = vset.pattern.permute.xlu0 %v259_v16 }
  0x1a   :  { %173 = vperm.xlu1 %254, %v131_v7   ;;  %169 = vperm.xlu0 %255, %v130_v13  }
  0x1e   :  { %177 = vperm.xlu1 %254, %v132_v12   ;;  %181 = vperm.xlu0 %255, %v133_v15  }
  0x88   :  { %v147_v17 = vpop.permute.xlu1 %146  ;;  %v137_v18 = vpop.permute.xlu0 %136 }
  0x8c   :  { %v152_v19 = vpop.permute.xlu1 %151  ;;  %v142_v20 = vpop.permute.xlu0 %141 }
  0x90   :  { %v157_v22 = vpop.permute.xlu0 %156 }
  0x91   :  { %v166_v21 = vpop.permute.xlu1 %165 }
  0x95   :  { %v174_v23 = vpop.permute.xlu1 %173  ;;  %v170_v24 = vpop.permute.xlu0 %169 }
  0x99   :  { %v178_v25 = vpop.permute.xlu1 %177  ;;  %v182_v34 = vpop.permute.xlu0 %181 }
  0xca   :  { %v105_v26 = vpop.f32.mrf.mxu0  ;;  %v120_v27 = vpop.f32.mrf.mxu1 }
  0xcb   :  { %v159_v28 = vmul.f32 %v137_v18, %v105_v26  ;;  %v162_v29 = vmul.f32 %v152_v19, %v120_v27 }
  0xcc   :  { %v227_v30 = vpop.f32.mrf.mxu0  ;;  %v236_v31 = vpop.f32.mrf.mxu1 }
  0xcd   :  { %v184_v32 = vadd.f32 %v166_v21, %v159_v28  ;;  %v187_v33 = vadd.f32 %v178_v25, %v162_v29 }
  0xce   :  { %v110_v35 = vpop.f32.mrf.mxu0  ;;  %v125_v36 = vpop.f32.mrf.mxu1 }
  0xcf   :  { %v189_v37 = vmax.f32 %v184_v32, 0.0  ;;  %v192_v38 = vmax.f32 %v187_v33, 0.0  ;;  %v160_v39 = vmul.f32 %v142_v20, %v110_v35  ;;  %v163_v40 = vmul.f32 %v157_v22, %v125_v36 }
  0xd0   :  { %v230_v41 = vpop.f32.mrf.mxu0  ;;  %v239_v42 = vpop.f32.mrf.mxu1 }
  0xd1   :  { %194 = vst.msk [vmem:[%s355_s3] sm:$0xff] %vm23_vm0, %v189_v37  ;;  %197 = vst.msk [vmem:[%s355_s3 + $0x18] sm:$0xff] %vm23_vm0, %v192_v38  ;;  %v185_v43 = vadd.f32 %v170_v24, %v160_v39  ;;  %v188_v44 = vadd.f32 %v182_v34, %v163_v40 }
  0xd2   :  { %v115_v45 = vpop.f32.mrf.mxu0 }
  0xd3   :  { %v190_v46 = vmax.f32 %v185_v43, 0.0  ;;  %v193_v47 = vmax.f32 %v188_v44, 0.0  ;;  %v161_v48 = vmul.f32 %v147_v17, %v115_v45 }
  0xd4   :  { %v233_v49 = vpop.f32.mrf.mxu0 }
  0xd5   :  { %195 = vst.msk [vmem:[%s355_s3 + $0x8] sm:$0xff] %vm23_vm0, %v190_v46  ;;  %198 = vst.msk [vmem:[%s355_s3 + $0x20] sm:$0xff] %vm23_vm0, %v193_v47  ;;  %v186_v50 = vadd.f32 %v174_v23, %v161_v48 }
  0xd7   :  { %v191_v51 = vmax.f32 %v186_v50, 0.0 }
  0xd9   :  { %196 = vst.msk [vmem:[%s355_s3 + $0x10] sm:$0xff] %vm23_vm0, %v191_v51 }

</bundles_post_ra>
